<compile_context>
chip_gen: v7x
topology: tpu7x:2x2x1
jax: 0.10.0
libtpu: 0.0.40
codegen_flags: <defaults>
</compile_context>

<pallas_src>
import math
import functools

import jax
import jax.numpy as jnp
from jax.experimental import pallas as pl
from jax.experimental.pallas import tpu as pltpu


def _round_up(x, m):
    return ((x + m - 1) // m) * m


def _cdiv(a, b):
    return -(-a // b)


# ----------------------------------------------------------------------------
# Pallas kernel: one (row-tile i, neighbor-chunk k) grid step.
#   xsq_ref : (1, tk)     ||X_j||^2 for this neighbor chunk
#   xm_ref  : (tm, CP)    lanes [0:C]=X_median, C=0, C+1=||X_median||^2, C+2=deg
#   a_ref   : (tm, tk)    adjacency tile (bf16 or f32 in HBM)
#   x_ref   : (tk, CP)    lanes [0:C]=X, C=1 (ones lane), rest 0
#   o_ref   : (tm, CP)    output tile (lane-dense; [:, :C] sliced by wrapper)
#   acc_ref : (tm, CP)    f32 running  w @ X_aug  (lane C carries sum_j w)
# ----------------------------------------------------------------------------
def _softmedian_kernel(xsq_ref, xm_ref, a_ref, x_ref, o_ref, acc_ref, *,
                       inv_tau, c, n_cols, mask_cols, mxu_dtype, exp_dtype):
    k = pl.program_id(1)
    tk = a_ref.shape[1]

    @pl.when(k == 0)
    def _init():
        acc_ref[...] = jnp.zeros_like(acc_ref)

    xm_blk = xm_ref[...]                                  # (tm, CP) f32
    xmsq = xm_blk[:, c + 1:c + 2]                         # (tm, 1)
    x = x_ref[...]                                        # (tk, CP) f32
    a = a_ref[...].astype(jnp.float32)                    # (tm, tk)

    xm_mx = xm_blk.astype(mxu_dtype)
    x_mx = x.astype(mxu_dtype)

    # cross[i,j] = <xm_i, x_j>  (NT-form dot over the lane axis of both — same
    # pattern as the Pallas flash-attention q @ k^T; the extra xmsq/deg lanes
    # of xm meet zero lanes of x so they contribute nothing).
    # TODO(synk): if the Mosaic dump ever shows a per-step vxpose here, stream a
    # pre-transposed (CP, tk) X^T chunk and use the canonical [M,K]x[K,N] form.
    cross = jax.lax.dot_general(
        xm_mx, x_mx, dimension_numbers=(((1,), (1,)), ((), ())),
        preferred_element_type=jnp.float32)               # (tm, tk)
    d2 = jnp.maximum(xmsq + xsq_ref[...] - 2.0 * cross, 0.0)

    # e_ij = exp(-dist/(T*sqrt(C)));  exp_dtype=bf16 uses the faster bf16 EUP
    # path on v6e/v7x (keep f32 on v5e).
    e = jnp.exp((-inv_tau) * jnp.sqrt(d2.astype(exp_dtype))).astype(jnp.float32)
    w = a * e

    if mask_cols:
        # Ragged last neighbor chunk: A is NOT zero-padded in HBM, so kill the
        # out-of-range columns here (also scrubs any garbage/NaN tail reads).
        col = k * tk + jax.lax.broadcasted_iota(jnp.int32, w.shape, 1)
        w = jnp.where(col < n_cols, w, 0.0)

    # Aggregation: the ones lane (index c) of X_aug makes this matmul also
    # produce sum_j w_ij — no separate cross-lane reduction / scratch needed.
    acc_ref[...] += jnp.dot(w.astype(mxu_dtype), x_mx,
                            preferred_element_type=jnp.float32)

    @pl.when(k == pl.num_programs(1) - 1)
    def _finalize():
        deg = xm_blk[:, c + 2:c + 3]                      # (tm, 1)
        rw = acc_ref[:, c:c + 1]                          # (tm, 1) = sum_j w
        # Exact reciprocal: finalize runs once per row tile, cost is negligible
        # (approx EUP reciprocal was flagged as marginal for 1e-3 accuracy).
        # NOTE: rows with zero degree give 0/0 here, exactly like the reference.
        norm = deg / rw
        o_ref[...] = (norm * acc_ref[...]).astype(o_ref.dtype)


# ----------------------------------------------------------------------------
# Tile selection: lane-dim multiples of 128 (or full dim), sublane multiples of
# 8 (or full dim), >= 2 row tiles when possible (v7x: 2 TensorCores), and a
# double-buffered VMEM working-set cap (v7x: 64 MiB physical / 32 MiB scoped).
# ----------------------------------------------------------------------------
def _pick_tiles(N, tm, tk, cp, a_itemsize, out_itemsize,
                vmem_budget=20 * 1024 * 1024):
    if N <= 128:
        tk_e = N                                  # full dim: always legal
    else:
        tk_e = min(_round_up(tk, 128), (N // 128) * 128)

    if N <= 8:
        tm_e = N
    else:
        tm_e = min(_round_up(tm, 8), (N // 8) * 8)
        if _cdiv(N, tm_e) < 2:
            tm_e = max(8, _round_up(_cdiv(N, 2), 8))   # feed both v7x cores

    def working_set(tm_, tk_):
        a_b = 2 * tm_ * tk_ * a_itemsize               # A tile (double-buffered)
        x_b = 2 * tk_ * cp * 4 + 2 * tk_ * 4           # X_aug chunk + xsq chunk
        xm_b = 2 * tm_ * cp * 4                        # X_median tile
        o_b = 2 * tm_ * cp * out_itemsize              # output tile
        acc_b = tm_ * cp * 4                           # accumulator scratch
        return a_b + x_b + xm_b + o_b + acc_b

    while working_set(tm_e, tk_e) > vmem_budget and tk_e > 128:
        tk_e = max(128, _round_up(tk_e // 2, 128))
    while working_set(tm_e, tk_e) > vmem_budget and tm_e > 8:
        tm_e = max(8, _round_up(tm_e // 2, 8))
    return tm_e, tk_e


def _soft_median_pallas(A, X, X_median, deg, *, temperature, tm, tk,
                        a_dtype, mxu_dtype, exp_dtype):
    N, C = X.shape
    inv_tau = 1.0 / (temperature * math.sqrt(C))
    cp = max(128, _round_up(C + 3, 128))          # lane-dense channel padding

    tm_e, tk_e = _pick_tiles(N, tm, tk, cp,
                             jnp.dtype(a_dtype).itemsize,
                             jnp.dtype(X.dtype).itemsize)
    cols_pad = _round_up(N, tk_e)

    # The ONLY wrapper-side touch of the N^2 adjacency is the (optional) dtype
    # cast for bf16 streaming — no zero-pad copy; ragged tails are masked
    # in-kernel. If A is already stored in a_dtype, nothing is copied at all.
    A_s = A if A.dtype == a_dtype else A.astype(a_dtype)

    f32 = jnp.float32
    x32 = X.astype(f32)
    xm32 = X_median.astype(f32)

    # X_aug: lanes [0:C]=X, lane C = 1 (ones lane -> row-sum of w via the MXU),
    # rest 0; rows zero-padded to a multiple of tk_e so masked columns never
    # meet garbage rows.
    X_aug = jnp.zeros((cols_pad, cp), f32)
    X_aug = X_aug.at[:N, :C].set(x32)
    X_aug = X_aug.at[:N, C].set(1.0)

    # Xm_aug: lanes [0:C]=X_median, lane C = 0 (meets the ones lane of X_aug),
    # lane C+1 = ||X_median||^2, lane C+2 = degree (side inputs merged away).
    Xm_aug = jnp.zeros((N, cp), f32)
    Xm_aug = Xm_aug.at[:, :C].set(xm32)
    Xm_aug = Xm_aug.at[:, C + 1].set(jnp.sum(xm32 * xm32, axis=-1))
    Xm_aug = Xm_aug.at[:, C + 2].set(deg.astype(f32))

    xsq = jnp.zeros((1, cols_pad), f32).at[0, :N].set(jnp.sum(x32 * x32, axis=-1))

    grid = (_cdiv(N, tm_e), cols_pad // tk_e)
    kernel = functools.partial(
        _softmedian_kernel, inv_tau=inv_tau, c=C, n_cols=N,
        mask_cols=(N % tk_e != 0), mxu_dtype=mxu_dtype, exp_dtype=exp_dtype)

    out = pl.pallas_call(
        kernel,
        out_shape=jax.ShapeDtypeStruct((N, cp), X.dtype),
        grid_spec=pltpu.PrefetchScalarGridSpec(
            num_scalar_prefetch=0,
            grid=grid,
            in_specs=[
                pl.BlockSpec((1, tk_e), lambda i, k: (0, k)),       # ||X_j||^2
                pl.BlockSpec((tm_e, cp), lambda i, k: (i, 0)),      # X_median(+norm,deg)
                pl.BlockSpec((tm_e, tk_e), lambda i, k: (i, k)),    # A tile
                pl.BlockSpec((tk_e, cp), lambda i, k: (k, 0)),      # X_aug chunk
            ],
            out_specs=pl.BlockSpec((tm_e, cp), lambda i, k: (i, 0)),
            scratch_shapes=[pltpu.VMEM((tm_e, cp), jnp.float32)],   # running w @ X_aug
        ),
        compiler_params=pltpu.CompilerParams(
            dimension_semantics=("parallel", "arbitrary"),
            vmem_limit_bytes=32 * 1024 * 1024),
    )(xsq, Xm_aug, A_s, X_aug)
    return out[:, :C]


# ----------------------------------------------------------------------------
# Glue: weighted-median indices (torch dense branch, channel-at-a-time).
# ----------------------------------------------------------------------------
def _weighted_median(A, X, *, channel_batch_bytes=256 << 20):
    # TODO(synk): argsort / per-channel cumsum median selection has no Pallas
    # sort primitive on TPU; it stays in plain JAX and may dominate end-to-end
    # time for large graphs (vmapped over channels when the [C,N,N] gather
    # fits, lax.map otherwise, per review).
    N, C = X.shape
    deg = jnp.sum(A, axis=-1)                                   # [N]
    half_deg = 0.5 * deg
    # NOTE: jnp.argsort is stable; torch.argsort is not — ties in X may pick a
    # different (equally valid) median node.
    sort = jnp.argsort(X, axis=0)                               # [N, C]

    def per_channel(sort_c):                                    # sort_c: [N]
        a_sorted = A[:, sort_c]                                 # [N, N]
        csum = jnp.cumsum(a_sorted, axis=-1)
        med_pos = jnp.sum(csum < half_deg[:, None], axis=-1)    # [N]
        return sort_c[med_pos]

    if N * N * C * 4 <= channel_batch_bytes:
        median_nodes = jax.vmap(per_channel)(sort.T)            # [C, N]
    else:
        median_nodes = jax.lax.map(per_channel, sort.T)         # [C, N]
    X_median = jnp.take_along_axis(X, median_nodes.T, axis=0)   # [N, C]
    return X_median, deg


def soft_median_propagation(A, X, *, temperature=1.0, tm=512, tk=1024,
                            a_dtype=jnp.bfloat16,
                            mxu_dtype=jnp.float32,
                            exp_dtype=jnp.float32):
    """Forward of SoftMedianPropagation (dense 2-D adjacency A, features X).

    a_dtype=bfloat16 halves the dominant HBM stream (exact for binary A; use
    float32 for weighted edges needing <1e-3 accuracy).  mxu_dtype / exp_dtype
    = bfloat16 enable the 2x MXU and bf16 EUP (sqrt/exp) paths on v6e / v7x
    (keep float32 on v5e — no bf16 VPU/EUP); defaults preserve 1e-3 accuracy.
    Every row of A must have at least one edge (same 0/0 as the reference).
    """
    X_median, deg = _weighted_median(A, X)
    return _soft_median_pallas(A, X, X_median, deg, temperature=temperature,
                               tm=tm, tk=tk, a_dtype=a_dtype,
                               mxu_dtype=mxu_dtype, exp_dtype=exp_dtype)


# ----------------------------------------------------------------------------
# Pure-JAX reference (real softmax, exactly as the PyTorch module).
# ----------------------------------------------------------------------------
def soft_median_reference(A, X, *, temperature=1.0):
    N, C = X.shape
    X_median, deg = _weighted_median(A, X)
    diff = X_median[:, None, :] - X[None, :, :]                 # [N, N, C]
    dist = jnp.linalg.norm(diff, axis=-1)                       # [N, N]
    weights = jax.nn.softmax(-dist / (temperature * math.sqrt(C)), axis=-1)
    A_w = weights * A
    norm = deg / jnp.sum(A_w, axis=-1)
    return (A_w * norm[:, None]) @ X


if __name__ == "__main__":
    key = jax.random.PRNGKey(0)
    k_a, k_w, k_x = jax.random.split(key, 3)

    N, C = 64, 32  # nodes, channels_in (channels_out == channels_in)

    # Binary adjacency + self loops: exact under the default bf16 A streaming,
    # and every row has at least one edge (no 0/0 normalizers).
    mask = (jax.random.uniform(k_a, (N, N)) < 0.4).astype(jnp.float32)
    A_bin = jnp.maximum(mask, jnp.eye(N, dtype=jnp.float32))
    X = jax.random.normal(k_x, (N, C), dtype=jnp.float32)

    out = soft_median_propagation(A_bin, X, temperature=1.0)
    out = jax.block_until_ready(out)
    ref = soft_median_reference(A_bin, X, temperature=1.0)
    assert out.shape == (N, C)
    assert jnp.allclose(out, ref, rtol=1e-3, atol=1e-3), "binary-A mismatch"

    # Weighted adjacency: stream A in f32 (bf16 A is ~3-digit accurate for
    # non-binary edge weights) and check against the same tight tolerance.
    weights = jax.random.uniform(k_w, (N, N), minval=0.5, maxval=1.5)
    A_wt = mask * weights + jnp.eye(N, dtype=jnp.float32)
    out_w = soft_median_propagation(A_wt, X, temperature=1.0,
                                    a_dtype=jnp.float32)
    out_w = jax.block_until_ready(out_w)
    ref_w = soft_median_reference(A_wt, X, temperature=1.0)
    assert jnp.allclose(out_w, ref_w, rtol=1e-3, atol=1e-3), "weighted-A mismatch"

    print("KERNEL_OK")
</pallas_src>

<mosaic_0001>
module attributes {stable_mosaic.version = 11 : i64} {
  func.func @_softmedian_kernel(%arg0: i32, %arg1: i32, %arg2: memref<1x64xf32, #tpu.memory_space<vmem>>, %arg3: memref<32x128xf32, #tpu.memory_space<vmem>>, %arg4: memref<32x64xbf16, #tpu.memory_space<vmem>>, %arg5: memref<64x128xf32, #tpu.memory_space<vmem>>, %arg6: memref<32x128xf32, #tpu.memory_space<vmem>>, %arg7: memref<32x128xf32, #tpu.memory_space<vmem>>) attributes {dimension_semantics = [#tpu.dimension_semantics<parallel>, #tpu.dimension_semantics<arbitrary>], iteration_bounds = array<i64: 2, 1>, scalar_prefetch = 0 : i64, scratch_operands = 1 : i64, tpu.core_type = #tpu.core_type<tc>, window_params = [{transform_indices = @transform_0, window_bounds = array<i64: 1, 64>}, {transform_indices = @transform_1, window_bounds = array<i64: 32, 128>}, {transform_indices = @transform_2, window_bounds = array<i64: 32, 64>}, {transform_indices = @transform_3, window_bounds = array<i64: 64, 128>}, {transform_indices = @transform_4, window_bounds = array<i64: 32, 128>}]} {
    %c0_i32 = arith.constant 0 : i32
    %0 = arith.cmpi eq, %arg1, %c0_i32 : i32
    %1 = arith.extui %0 : i1 to i32
    %c0_i32_0 = arith.constant 0 : i32
    %2 = arith.cmpi ne, %1, %c0_i32_0 : i32
    scf.if %2 {
      %cst_18 = arith.constant 0.000000e+00 : f32
      %30 = vector.broadcast %cst_18 : f32 to vector<32x128xf32>
      %c0_19 = arith.constant 0 : index
      %c0_20 = arith.constant 0 : index
      %31 = vector.load %arg7[%c0_19, %c0_20] : memref<32x128xf32, #tpu.memory_space<vmem>>, vector<32x128xf32>
      tpu.vector_store %arg7[%c0_19, %c0_20], %30 {strides = array<i32>} : memref<32x128xf32, #tpu.memory_space<vmem>>, vector<32x128xf32>,
    } else {
    }
    %c0 = arith.constant 0 : index
    %c0_1 = arith.constant 0 : index
    %3 = vector.load %arg3[%c0, %c0_1] : memref<32x128xf32, #tpu.memory_space<vmem>>, vector<32x128xf32>
    %4 = vector.extract_strided_slice %3 {offsets = [0, 33], sizes = [32, 1], strides = [1, 1]} : vector<32x128xf32> to vector<32x1xf32>
    %c0_2 = arith.constant 0 : index
    %c0_3 = arith.constant 0 : index
    %5 = vector.load %arg5[%c0_2, %c0_3] : memref<64x128xf32, #tpu.memory_space<vmem>>, vector<64x128xf32>
    %c0_4 = arith.constant 0 : index
    %c0_5 = arith.constant 0 : index
    %6 = vector.load %arg4[%c0_4, %c0_5] : memref<32x64xbf16, #tpu.memory_space<vmem>>, vector<32x64xbf16>
    %7 = arith.extf %6 : vector<32x64xbf16> to vector<32x64xf32>
    %cst = arith.constant dense<0.000000e+00> : vector<32x64xf32>
    %8 = tpu.matmul %3, %5, %cst {dimension_numbers = #tpu.dot_dimension_numbers<[1], [1], [0], [0], [0, 0, 1, 0], [], []>} : vector<32x128xf32>, vector<64x128xf32>, vector<32x64xf32> -> vector<32x64xf32>
    %c0_6 = arith.constant 0 : index
    %c0_7 = arith.constant 0 : index
    %9 = vector.load %arg2[%c0_6, %c0_7] : memref<1x64xf32, #tpu.memory_space<vmem>>, vector<1x64xf32>
    %10 = vector.broadcast %4 : vector<32x1xf32> to vector<32x64xf32>
    %11 = vector.broadcast %9 : vector<1x64xf32> to vector<32x64xf32>
    %12 = arith.addf %10, %11 : vector<32x64xf32>
    %cst_8 = arith.constant 2.000000e+00 : f32
    %13 = vector.broadcast %cst_8 : f32 to vector<32x64xf32>
    %14 = arith.mulf %13, %8 : vector<32x64xf32>
    %15 = arith.subf %12, %14 : vector<32x64xf32>
    %cst_9 = arith.constant 0.000000e+00 : f32
    %16 = vector.broadcast %cst_9 : f32 to vector<32x64xf32>
    %17 = arith.maximumf %15, %16 : vector<32x64xf32>
    %18 = math.sqrt %17 : vector<32x64xf32>
    %cst_10 = arith.constant -0.176776692 : f32
    %19 = vector.broadcast %cst_10 : f32 to vector<32x64xf32>
    %20 = arith.mulf %19, %18 : vector<32x64xf32>
    %21 = math.exp %20 : vector<32x64xf32>
    %22 = arith.mulf %7, %21 : vector<32x64xf32>
    %c0_11 = arith.constant 0 : index
    %c0_12 = arith.constant 0 : index
    %23 = vector.load %arg7[%c0_11, %c0_12] : memref<32x128xf32, #tpu.memory_space<vmem>>, vector<32x128xf32>
    %cst_13 = arith.constant dense<0.000000e+00> : vector<32x128xf32>
    %24 = tpu.matmul %22, %5, %cst_13 {dimension_numbers = #tpu.dot_dimension_numbers<[1], [0], [0], [1], [0, 0, 1, 1], [], []>} : vector<32x64xf32>, vector<64x128xf32>, vector<32x128xf32> -> vector<32x128xf32>
    %25 = arith.addf %23, %24 : vector<32x128xf32>
    %c0_14 = arith.constant 0 : index
    %c0_15 = arith.constant 0 : index
    %26 = vector.load %arg7[%c0_14, %c0_15] : memref<32x128xf32, #tpu.memory_space<vmem>>, vector<32x128xf32>
    tpu.vector_store %arg7[%c0_14, %c0_15], %25 {strides = array<i32>} : memref<32x128xf32, #tpu.memory_space<vmem>>, vector<32x128xf32>,
    %c0_i32_16 = arith.constant 0 : i32
    %27 = arith.cmpi eq, %arg1, %c0_i32_16 : i32
    %28 = arith.extui %27 : i1 to i32
    %c0_i32_17 = arith.constant 0 : i32
    %29 = arith.cmpi ne, %28, %c0_i32_17 : i32
    scf.if %29 {
      %30 = vector.extract_strided_slice %3 {offsets = [0, 34], sizes = [32, 1], strides = [1, 1]} : vector<32x128xf32> to vector<32x1xf32>
      %c0_18 = arith.constant 0 : index
      %c32 = arith.constant 32 : index
      %31 = vector.load %arg7[%c0_18, %c32] : memref<32x128xf32, #tpu.memory_space<vmem>>, vector<32x1xf32>
      %32 = arith.divf %30, %31 : vector<32x1xf32>
      %c0_19 = arith.constant 0 : index
      %c0_20 = arith.constant 0 : index
      %33 = vector.load %arg7[%c0_19, %c0_20] : memref<32x128xf32, #tpu.memory_space<vmem>>, vector<32x128xf32>
      %34 = vector.broadcast %32 : vector<32x1xf32> to vector<32x128xf32>
      %35 = arith.mulf %34, %33 : vector<32x128xf32>
      %c0_21 = arith.constant 0 : index
      %c0_22 = arith.constant 0 : index
      %36 = vector.load %arg6[%c0_21, %c0_22] : memref<32x128xf32, #tpu.memory_space<vmem>>, vector<32x128xf32>
      tpu.vector_store %arg6[%c0_21, %c0_22], %35 {strides = array<i32>} : memref<32x128xf32, #tpu.memory_space<vmem>>, vector<32x128xf32>,
    } else {
    }
    return
  }
  func.func @transform_0(%arg0: i32, %arg1: i32) -> (i32, i32) {
    %c0_i32 = arith.constant 0 : i32
    %c0_i32_0 = arith.constant 0 : i32
    return %c0_i32, %arg1 : i32, i32
  }
  func.func @transform_1(%arg0: i32, %arg1: i32) -> (i32, i32) {
    %c0_i32 = arith.constant 0 : i32
    %c0_i32_0 = arith.constant 0 : i32
    return %arg0, %c0_i32 : i32, i32
  }
  func.func @transform_2(%arg0: i32, %arg1: i32) -> (i32, i32) {
    %c0_i32 = arith.constant 0 : i32
    return %arg0, %arg1 : i32, i32
  }
  func.func @transform_3(%arg0: i32, %arg1: i32) -> (i32, i32) {
    %c0_i32 = arith.constant 0 : i32
    %c0_i32_0 = arith.constant 0 : i32
    return %arg1, %c0_i32 : i32, i32
  }
  func.func @transform_4(%arg0: i32, %arg1: i32) -> (i32, i32) {
    %c0_i32 = arith.constant 0 : i32
    %c0_i32_0 = arith.constant 0 : i32
    return %arg0, %c0_i32 : i32, i32
  }
}

</mosaic_0001>

<bundles_post_ra>
// kernel: tpu_custom_call.1
= control target key start
LH: loop header
LB: loop body
LE: loop exit
PB: predicated region body
PF: predicated region fallthrough
CT: control target
= control target key end

     0   :  { %s1666_s0 = inlined_call_operand.hbm [shape: f32[1,64], index: 0, kind: input, shape index: {}]   ;;  %s1667_s1 = inlined_call_operand.hbm [shape: f32[64,128], index: 1, kind: input, shape index: {}]   ;;  %s1668_s2 = inlined_call_operand.hbm [shape: bf16[64,64], index: 2, kind: input, shape index: {}]   ;;  %s1669_s3 = inlined_call_operand.hbm [shape: f32[64,128], index: 3, kind: input, shape index: {}]   ;;  %s1670_s4 = inlined_call_operand.hbm [shape: f32[64,128], index: 4, kind: output, shape index: {}]  }
   0x1   :  { %1682 = sst [smem:[#allocation19_spill]] %s1667_s1 }
   0x2   :  { %9 = vsyncpa [#allocation4], 0 }
   0x3   :  { %10 = vsyncpa [#allocation7], 0 }
   0x4   :  { %12 = vsyncpa [#allocation7 + $0x1], 0 }
   0x5   :  { %13 = vsyncpa [#allocation10], 0 }
   0x6   :  { %14 = vsyncpa [#allocation5], 0 }
   0x7   :  { %16 = vsyncpa [#allocation5 + $0x1], 0  ;;  %s1339_s15 = smov 0   ;;  %s1341_s16 = smov 0  }
   0x8   :  { %s1343_s17 = smov 0   ;;  %s1345_s18 = smov 0  }
   0x9   :  { %s1347_s19 = smov 0   ;;  %s1349_s20 = smov 0  }
   0xa LB: > { %1683 = sst [smem:[#allocation16_spill]] %s1294_s19  ;;  %s34_s21 = sadd.s32 1, %s1294_s19  ;;  %s1298_s20 = sphi %s1349_s20, %s22_s20   ;;  %s1294_s19 = sphi %s1347_s19, %s1710_s19   ;;  %s1290_s18 = sphi %s1345_s18, %s1709_s18   ;;  %s1286_s17 = sphi %s1343_s17, %s1713_s17   ;;  %s1282_s16 = sphi %s1341_s16, %s1712_s16   ;;  %s1278_s15 = sphi %s1339_s15, %s1711_s15  }
   0xb   : > { %s67_s22 = sadd.s32 1, %s1286_s17  ;;  %p36_p0 = scmp.ge.s32.totalorder %s34_s21, 2 }
   0xc   : > { %p74_p1 = scmp.ne.s32.totalorder %s1286_s17, %s1282_s16  ;;  %p75_p2 = scmp.eq.s32.totalorder %s1298_s20, 0 }
   0xd   : > { %s1715_s21 = smov (%p36_p0, %s34_s21), 0  ;;  %p1001_p6 = scmp.lt.s32.totalorder %s1298_s20, 2 }
   0xe   : > { %1684 = sst [smem:[#allocation17_spill]] %s1715_s21  ;;  %p1379_p3 = por %p75_p2, %p74_p1 }
   0xf   : > { %s64_s24 = ssub.s32 %s1294_s19, %s1715_s21  ;;  %s213_s25 = sand.u32 1, %s1298_s20  }
  0x10   : > { %p65_p5 = scmp.eq.s32.totalorder %s64_s24, 0  ;;  %s215_s26 = sand.u32 1, %s1286_s17  }
  0x11   : > { %s833_s28 = sshll.u32 %s215_s26, 5  ;;  %s855_s29 = sshll.u32 %s1294_s19, 9 }
  0x12   : > { %s1390_s27 = scalar_select %p65_p5, %s1286_s17, %s67_s22  }
  0x13   : > { %s1687_s1 = sld [smem:[#allocation19_spill]]  ;;  %s217_s7 = scalar_lea.vmem [#allocation6], %s833_s28 }
  0x14   : > { %1686 = sst [smem:[#allocation18_spill]] %s1390_s27  ;;  %s224_s8 = sshll.u32 %s217_s7, 4  ;;  %s1398_s8 = int_to_ptr.vmem [resolvable:$true] %s224_s8 }
  0x15   : > { %p1402_p7 = pnand %p1001_p6, %p1379_p3  ;;  %s1406_s10 = sshll.u32 %s215_s26, 4 }
  0x16   : > { %s1408_s11 = scalar_lea.sflag [#allocation7], %s213_s25 }
  0x17   : > { %s1688_s9 = scalar_select %p1402_p7, 1, 0 }
  0x18   : > { %p1676_p9 = pneg %p1402_p7 }
  0x19   : > { %s1396_s6 = scalar_lea.hbm %s1687_s1, %s855_s29  ;;  %s1097_s22 = scalar_lea.hbm %s1687_s1, 1024 }
  0x1a   : > { %s1092_s12 = scalar_lea.hbm %s1396_s6, 512  ;;  %p1098_p12 = scmp.lt.u32.totalorder %s1396_s6, %s1687_s1 }
  0x1b   : > { %p1093_p8 = scmp.ne.s32.totalorder %s1396_s6, %s1092_s12  ;;  %p1099_p13 = scmp.lt.u32.totalorder %s1097_s22, %s1092_s12 }
  0x1c   : > { %p1101_p2 = scmp.lt.u32.totalorder %s1092_s12, %s1396_s6 }
  0x1d   : > { %p1095_p10 = pnand %p1676_p9, %p1093_p8  ;;  %p1100_p0 = por %p1099_p13, %p1098_p12 }
  0x1f   : > { %p1096_p11 = pneg %p1095_p10  ;;  %p1102_p3 = por %p1101_p2, %p1100_p0 }
  0x21   : > { %p1103_p5 = pnand %p1102_p3, %p1096_p11 }
  0x23   : > { %1106 = shalt.err (!%p1103_p5)
}
  0x24   : > { %s1107_s25 = scalar_lea.vmem %s1398_s8, 512  ;;  %s1300_s26 = smov [#allocation6]  }
  0x25   : > { %p1108_p6 = scmp.ne.s32.totalorder %s1398_s8, %s1107_s25  ;;  %s1112_s28 = sshll.u32 %s1300_s26, 4  ;;  %s1113_s28 = int_to_ptr.vmem [resolvable:$false] %s1112_s28 }
  0x26   : > { %s1114_s29 = scalar_lea.vmem %s1113_s28, 1024  ;;  %p1115_p4 = scmp.lt.s32.totalorder %s1398_s8, %s1113_s28 }
  0x27   : > { %p1110_p8 = pnand %p1108_p6, %p1676_p9  ;;  %p1116_p12 = scmp.lt.s32.totalorder %s1114_s29, %s1107_s25 }
  0x29   : > { %p1111_p10 = pneg %p1110_p8  ;;  %p1117_p13 = por %p1116_p12, %p1115_p4 }
  0x2b   : > { %p1118_p0 = pnand %p1117_p13, %p1111_p10 }
  0x2d   : > { %1121 = shalt.err (!%p1118_p0)
}
  0x2e   : > { %s1671_s30 = smov 128   ;;  %s1672_s5 = smov 8  }
  0x2f   : > { %991 = dma.hbm_to_vmem [thread:$0]  (!%p1402_p7), %s1396_s6, 512, %s1398_s8, %s1408_s11, %s1671_s30, %s1671_s30, %s1672_s5  }
  0x30   : > { %s1440_s7 = sadd.s32 4294967295, %s1298_s20   ;;  %s828_s12 = sadd.s32 4294967294, %s1298_s20  }
  0x31   : > { %p80_p4 = scmp.ne.s32.totalorder %s1282_s16, %s1278_s15  ;;  %p1675_p11 = scmp.eq.s32.totalorder %s1440_s7, 0 }
  0x32   : > { %p158_p2 = scmp.eq.s32.totalorder %s1440_s7, 1  ;;  %p164_p3 = scmp.eq.s32.totalorder %s828_s12, 1 }
  0x33   : > { %p1449_p5 = por %p1675_p11, %p80_p4  ;;  %p829_p6 = scmp.ge.s32.totalorder %s1298_s20, 1 }
  0x34   : > { %p1457_p8 = por %p158_p2, %p74_p1  ;;  %p1461_p10 = por %p164_p3, %p80_p4 }
  0x35   : > { %s1689_s13 = scalar_select %p1449_p5, 1, 0 }
  0x36   : > { %s1690_s6 = scalar_select %p1457_p8, 1, 0 }
  0x37   : > { %s1691_s8 = scalar_select %p1461_p10, 1, 0 }
  0x38   : > { %p171_p12 = scmp.lt.s32.totalorder %s1298_s20, 3  ;;  %s1303_s22 = smov [#allocation3]  }
  0x39   : > { %s186_s23 = sshll.u32 %s1303_s22, 4  ;;  %s238_s24 = scalar_lea.vmem [#allocation8], %s1406_s10  ;;  %s187_s23 = int_to_ptr.vmem [resolvable:$true] %s186_s23 }
  0x3a   : > { %p1466_p13 = pnand %p829_p6, %p171_p12  ;;  %s246_s25 = sshll.u32 %s238_s24, 4  ;;  %s1482_s25 = int_to_ptr.vmem [resolvable:$true] %s246_s25 }
  0x3b   : > { %s1304_s26 = smov [#allocation9]   ;;  %s856_s29 = sshll.u32 %s1294_s19, 8 }
  0x3c   : > { %s1692_s14 = scalar_select %p1466_p13, 1, 0 }
  0x3d   : > { %s199_s28 = sshll.u32 %s1304_s26, 4  ;;  %p981_p1 = pneg %p1466_p13  ;;  %s1473_s28 = int_to_ptr.vmem [resolvable:$true] %s199_s28 }
  0x3e   : > { %s1487_s24 = scalar_lea.hbm %s1668_s2, %s856_s29  ;;  %s1122_s5 = scalar_lea.hbm %s1666_s0, 16 }
  0x3f   : > { %p1478_p0 = pnand %p981_p1, %p1675_p11  ;;  %p1123_p4 = scmp.ne.s32.totalorder %s1666_s0, %s1122_s5 }
  0x40   : > { %p1129_p12 = scmp.lt.u32.totalorder %s1122_s5, %s1666_s0 }
  0x41   : > { %p1124_p2 = pneg %p1478_p0 }
  0x43   : > { %p1125_p3 = pnand %p1124_p2, %p1123_p4 }
  0x45   : > { %p1126_p6 = pneg %p1125_p3 }
  0x47   : > { %p1131_p1 = pnand %p1129_p12, %p1126_p6 }
  0x49   : > { %1134 = shalt.err (!%p1131_p1)
}
  0x4a   : > { %s1135_s29 = scalar_lea.vmem %s187_s23, 16  ;;  %s1142_s1 = scalar_lea.vmem %s187_s23, 32 }
  0x4b   : > { %p1136_p11 = scmp.ne.s32.totalorder %s187_s23, %s1135_s29  ;;  %p1143_p8 = scmp.lt.s32.totalorder %s187_s23, %s187_s23 }
  0x4c   : > { %p1144_p5 = scmp.lt.s32.totalorder %s1142_s1, %s1135_s29 }
  0x4d   : > { %p1138_p9 = pnand %p1136_p11, %p1124_p2 }
  0x4e   : > { %p1145_p13 = por %p1144_p5, %p1143_p8 }
  0x4f   : > { %p1139_p10 = pneg %p1138_p9 }
  0x51   : > { %p1146_p7 = pnand %p1145_p13, %p1139_p10 }
  0x53   : > { %1149 = shalt.err (!%p1146_p7)
}
  0x54   : > { %984 = dma.hbm_to_vmem [thread:$0]  (!%p1478_p0), %s1666_s0, 16, %s187_s23, [#allocation4]  }
  0x55   : > { %s1150_s5 = scalar_lea.hbm %s1669_s3, 1024 }
  0x56   : > { %p1151_p9 = scmp.ne.s32.totalorder %s1669_s3, %s1150_s5  ;;  %p1157_p7 = scmp.lt.u32.totalorder %s1150_s5, %s1669_s3 }
  0x58   : > { %p1153_p11 = pnand %p1151_p9, %p1124_p2 }
  0x5a   : > { %p1154_p5 = pneg %p1153_p11 }
  0x5c   : > { %p1159_p8 = pnand %p1157_p7, %p1154_p5 }
  0x5e   : > { %1162 = shalt.err (!%p1159_p8)
}
  0x5f   : > { %s1163_s23 = scalar_lea.vmem %s1473_s28, 1024  ;;  %p1171_p3 = scmp.lt.s32.totalorder %s1473_s28, %s1473_s28 }
  0x60   : > { %p1164_p10 = scmp.ne.s32.totalorder %s1473_s28, %s1163_s23  ;;  %p1172_p6 = scmp.lt.s32.totalorder %s1163_s23, %s1163_s23 }
  0x62   : > { %p1166_p13 = pnand %p1164_p10, %p1124_p2  ;;  %p1173_p12 = por %p1172_p6, %p1171_p3 }
  0x64   : > { %p1167_p4 = pneg %p1166_p13 }
  0x66   : > { %p1174_p1 = pnand %p1173_p12, %p1167_p4 }
  0x68   : > { %1177 = shalt.err (!%p1174_p1)
}
  0x69   : > { %s1694_s1 = smov 8   ;;  %s1695_s21 = smov 128  }
  0x6a   : > { %987 = dma.hbm_to_vmem [thread:$0]  (!%p1478_p0), %s1669_s3, 1024, %s1473_s28, [#allocation10], %s1695_s21, %s1695_s21, %s1694_s1  }
  0x6b   : > { %s1178_s30 = scalar_lea.hbm %s1487_s24, 256  ;;  %p1696_p9 = scmp.ne.s32.totalorder %s1688_s9, 0 }
  0x6c   : > { %p1179_p2 = scmp.ne.s32.totalorder %s1487_s24, %s1178_s30  ;;  %s1183_s22 = scalar_lea.hbm %s1668_s2, 512 }
  0x6d   : > { %p1697_p11 = pneg %p1696_p9  ;;  %p1184_p8 = scmp.lt.u32.totalorder %s1487_s24, %s1668_s2 }
  0x6e   : > { %p1185_p10 = scmp.lt.u32.totalorder %s1183_s22, %s1178_s30  ;;  %p1187_p4 = scmp.lt.u32.totalorder %s1178_s30, %s1487_s24 }
  0x6f   : > { %p1181_p5 = pnand %p1179_p2, %p1697_p11 }
  0x70   : > { %p1186_p13 = por %p1185_p10, %p1184_p8 }
  0x71   : > { %p1182_p7 = pneg %p1181_p5 }
  0x72   : > { %p1188_p3 = por %p1187_p4, %p1186_p13 }
  0x74   : > { %p1189_p6 = pnand %p1188_p3, %p1182_p7 }
  0x76   : > { %1192 = shalt.err (!%p1189_p6)
}
  0x77   : > { %s1193_s28 = scalar_lea.vmem %s1482_s25, 256  ;;  %p1698_p12 = pmov %p1697_p11 }
  0x78   : > { %p1194_p0 = scmp.ne.s32.totalorder %s1482_s25, %s1193_s28  ;;  %s1305_s29 = smov [#allocation8]  }
  0x79   : > { %s1198_s23 = sshll.u32 %s1305_s29, 4  ;;  %s1199_s23 = int_to_ptr.vmem [resolvable:$false] %s1198_s23 }
  0x7a   : > { %p1196_p1 = pnand %p1194_p0, %p1698_p12  ;;  %s1200_s1 = scalar_lea.vmem %s1199_s23, 512 }
  0x7b   : > { %p1201_p11 = scmp.lt.s32.totalorder %s1482_s25, %s1199_s23  ;;  %p1202_p5 = scmp.lt.s32.totalorder %s1200_s1, %s1193_s28 }
  0x7c   : > { %p1197_p2 = pneg %p1196_p1 }
  0x7d   : > { %p1203_p8 = por %p1202_p5, %p1201_p11 }
  0x7f   : > { %p1204_p10 = pnand %p1203_p8, %p1197_p2 }
  0x81   : > { %1207 = shalt.err (!%p1204_p10)
}
  0x82   : > { %s1306_s21 = smov 64   ;;  %s1307_s19 = smov 4  }
  0x83   : > { %994 = dma.hbm_to_vmem [thread:$0]  (!%p1696_p9), %s1487_s24, 256, %s1482_s25, %s1408_s11, %s1306_s21, %s1306_s21, %s1307_s19  }
  0x84   : > { %p1699_p7 = scmp.ne.s32.totalorder %s1692_s14, 0 }
  0x85   : > { %p1700_p13 = scmp.eq.s32.totalorder (!%p1699_p7), %s1440_s7, 0 }
  0x86   : > { %258 = sbr.rel (%p1699_p7) target bundleno = 927 (0x39f), region = 36 }
  0x8d   : > { %1261 = dma.done.wait (%p1700_p13), [#allocation4], 16   ;;  %p1701_p4 = pmov %p1700_p13 }
  0x8e   : > { %s264_s27 = sand.u32 1, %s1440_s7   ;;  %s1571_s30 = sand.u32 1, %s1282_s16  }
  0x8f   : > { %1263 = vsyncadd (%p1701_p4), [#allocation4], 4294967280  ;;  %s841_s12 = sshll.u32 %s1571_s30, 5  ;;  %s265_s9 = scalar_lea.sflag [#allocation7], %s264_s27 }
  0x90   : > { %s268_s11 = scalar_lea.vmem [#allocation6], %s841_s12  ;;  %p1702_p9 = scmp.ne.s32.totalorder %s1689_s13, 0 }
  0x92   : > { %1265 = dma.done.wait (%p1702_p9), %s265_s9, 768  }
  0x93   : > { %1267 = vsyncadd (%p1702_p9), %s265_s9, 4294966528  ;;  %s842_s14 = sshll.u32 %s1571_s30, 4  ;;  %p1703_p3 = pmov %p1701_p4 }
  0x94   : > { %s1581_s25 = scalar_lea.vmem [#allocation8], %s842_s14 }
  0x95   : > { %1269 = dma.done.wait (%p1703_p3), [#allocation10], 1024   ;;  %p1704_p6 = pmov %p1703_p3 }
  0x96   : > { %v1308_v0 = vmov 33   ;;  %v327_v1 = vld [vmem:[#allocation9] sm:$0xff]  ;;  %v328_v2 = vld [vmem:[#allocation9 + $0x8] sm:$0xff]  ;;  %v329_v3 = vld [vmem:[#allocation9 + $0x10] sm:$0xff]  ;;  %vm519_vm8 = vcmask 523264   ;;  %s1310_s7 = smov 2  }
  0x97   : > { %1271 = vsyncadd (%p1704_p6), [#allocation10], 4294966272  ;;  %1064 = vset.pattern.permute.xlu0 %v1308_v0  ;;  %1065 = vset.pattern.permute.xlu1 %v1308_v0  ;;  %v935_v4 = vpack.c.bf16 %v328_v2, %v327_v1  ;;  %v330_v5 = vld [vmem:[#allocation9 + $0x18] sm:$0xff]  ;;  %v1587_v7 = vld [vmem:[%s268_s11] sm:$0xff]  ;;  %s310_s13 = scalar_lea.vmem [#allocation11], %s841_s12  ;;  %s857_s5 = sshll.u32 %s1290_s18, 9 }
  0x98   : > { %v939_v6 = vpack.c.bf16 %v330_v5, %v329_v3  ;;  %907 = vmatprep.mubr.f32.mxu0 %v1587_v7  ;;  %v1590_v8 = vld [vmem:[%s268_s11 + $0x10] sm:$0xff]  ;;  %431 = vperm.xlu0 %1064, %v1587_v7   ;;  %v331_v9 = vld [vmem:[#allocation9 + $0x20] sm:$0xff]  ;;  %v332_v10 = vld [vmem:[#allocation9 + $0x28] sm:$0xff]  ;;  %s698_s24 = sshll.u32 %s310_s13, 4  ;;  %s1617_s26 = scalar_lea.hbm %s1670_s4, %s857_s5  ;;  %s1612_s24 = int_to_ptr.vmem [resolvable:$true] %s698_s24 }
  0x99   : > { %936 = vmatprep.subr.bf16.mxu0 %v935_v4  ;;  %441 = vperm.xlu1 %1065, %v1590_v8   ;;  %v1594_v11 = vld [vmem:[%s268_s11 + $0x8] sm:$0xff]  ;;  %v1596_v12 = vld [vmem:[%s268_s11 + $0x18] sm:$0xff]  ;;  %v943_v13 = vpack.c.bf16 %v332_v10, %v331_v9  ;;  %v333_v14 = vld [vmem:[#allocation9 + $0x30] sm:$0xff]  ;;  %s685_s28 = scalar_lea.sflag [#allocation5], %s1571_s30  ;;  %s1208_s29 = scalar_lea.vmem %s1612_s24, 512 }
  0x9a   : > { %938 = vmatpush3.bf16.xpose.msra.mxu0 %v935_v4  ;;  %952 = vmatprep.subr.bf16.mxu1 %v935_v4  ;;  %v334_v15 = vld [vmem:[#allocation9 + $0x38] sm:$0xff]  ;;  %p1209_p0 = scmp.ne.s32.totalorder %s1612_s24, %s1208_s29  ;;  %p1705_p12 = scmp.ne.s32.totalorder %s1690_s6, 0 }
  0x9b   : > { %940 = vmatprep.subr.bf16.mxu0 %v939_v6  ;;  %954 = vmatpush3.bf16.msra.mxu1 %v935_v4  ;;  %v947_v16 = vpack.c.bf16 %v334_v15, %v333_v14  ;;  %v845_v19 = vld [vmem:[#allocation3] ss:$0 sm:$0xff]  ;;  %s1311_s18 = smov [#allocation11]  }
  0x9c   : > { %436 = vperm.xlu0 %1064, %v1594_v11   ;;  %956 = vmatprep.subr.bf16.mxu1 %v939_v6  ;;  %v866_v14 = vld [vmem:[%s1581_s25 + $0x8] sm:$0xff]   ;;  %p1210_p1 = pnand %p1209_p0, %p1705_p12  ;;  %s1212_s23 = sshll.u32 %s1311_s18, 4  ;;  %s1213_s23 = int_to_ptr.vmem [resolvable:$false] %s1212_s23 }
  0x9d   : > { %446 = vperm.xlu1 %1065, %v1596_v12   ;;  %s1214_s1 = scalar_lea.vmem %s1213_s23, 1024  ;;  %p1215_p11 = scmp.lt.s32.totalorder %s1612_s24, %s1213_s23 }
  0x9e   : > { %p1211_p2 = pneg %p1210_p1  ;;  %p1216_p5 = scmp.lt.s32.totalorder %s1214_s1, %s1208_s29 }
  0x9f   : > { %958 = vmatpush3.bf16.msra.mxu1 %v939_v6 }
  0xa0   : > { %960 = vmatprep.subr.bf16.mxu1 %v943_v13  ;;  %p1217_p8 = por %p1216_p5, %p1215_p11 }
  0xa2   : > { %942 = vmatpush3.bf16.xpose.msra.mxu0 %v939_v6  ;;  %v859_v6 = vld [vmem:[%s1581_s25] sm:$0xff]   ;;  %p1218_p10 = pnand %p1217_p8, %p1211_p2 }
  0xa3   : > { %944 = vmatprep.subr.bf16.mxu0 %v943_v13  ;;  %962 = vmatpush3.bf16.msra.mxu1 %v943_v13  ;;  %v860_v9 = vunpack.c.l.bf16 %v859_v6  ;;  %v861_v10 = vunpack.c.h.bf16 %v859_v6 }
  0xa4   : > { %964 = vmatprep.subr.bf16.mxu1 %v947_v16 }
  0xa7   : > { %966 = vmatpush3.bf16.msra.mxu1 %v947_v16 }
  0xaa   : > { %946 = vmatpush3.bf16.xpose.msra.mxu0 %v943_v13 }
  0xab   : > { %948 = vmatprep.subr.bf16.mxu0 %v947_v16 }
  0xb2   : > { %950 = vmatpush3.bf16.xpose.msra.mxu0 %v947_v16 }
  0xb9   : > { %908 = vmatmul.mubr.f32.vlgmr.msra.gmra.mrb[0].mxu0 %v1594_v11 }
  0xba   : > { %910 = vmatprep.mubr.f32.mxu0 %v1590_v8 }
  0xbd   : > { %911 = vmatmul.mubr.f32.gmra.mrb[2].mxu0 %v1596_v12 }
 0x117   : > { %v432_v17 = vpop.permute.xlu0 %431 }
 0x118   : > { %v442_v18 = vpop.permute.xlu1 %441  ;;  %v455_v25 = vadd.f32 %v845_v19, %v432_v17 }
 0x119   : > { %v457_v34 = vadd.f32 %v845_v19, %v442_v18  ;;  %v864_v18 = vunpack.c.l.bf16 %v866_v14 }
 0x11b   : > { %v437_v20 = vpop.permute.xlu0 %436 }
 0x11c   : > { %v456_v22 = vadd.f32 %v845_v19, %v437_v20  ;;  %v447_v28 = vpop.permute.xlu1 %446 }
 0x11d   : > { %v458_v36 = vadd.f32 %v845_v19, %v447_v28  ;;  %v865_v19 = vunpack.c.h.bf16 %v866_v14 }
 0x18c   : > { %v909_v21 = vpop.f32.mrb[0].mxu0 }
 0x18d   : > { %v460_v23 = vmul.f32 2.0, %v909_v21  ;;  %v409_v24 = vpop.f32.mrb[1].mxu0 }
 0x18e   : > { %v459_v26 = vmul.f32 2.0, %v409_v24  ;;  %v1309_v24 = vmov 34  }
 0x18f   : > { %v464_v27 = vsub.f32 %v456_v22, %v460_v23  ;;  %1066 = vset.pattern.permute.xlu1 %v1309_v24  ;;  %1067 = vset.pattern.permute.xlu0 %v1309_v24 }
 0x190   : > { %v463_v29 = vsub.f32 %v455_v25, %v459_v26  ;;  %v912_v30 = vpop.f32.mrb[2].mxu0 }
 0x191   : > { %v468_v31 = vmax.f32 %v464_v27, 0.0  ;;  %v462_v32 = vmul.f32 2.0, %v912_v30  ;;  %v419_v33 = vpop.f32.mrb[3].mxu0 }
 0x192   : > { %v467_v35 = vmax.f32 %v463_v29, 0.0  ;;  %v461_v37 = vmul.f32 2.0, %v419_v33 }
 0x193   : > { %1068 = vrsqrt.f32 %v468_v31  ;;  %v466_v38 = vsub.f32 %v458_v36, %v462_v32  ;;  %vm480_vm0 = vcmp.eq.f32.partialorder %v468_v31, inf  ;;  %v483_v45 = vand.u32 2147483648, %v468_v31 }
 0x194   : > { %1070 = vrsqrt.f32 %v467_v35  ;;  %v465_v39 = vsub.f32 %v457_v34, %v461_v37  ;;  %vm482_vm1 = vcmp.eq.f32.partialorder %v468_v31, 0.0  ;;  %vm473_vm2 = vcmp.eq.f32.partialorder %v467_v35, inf }
 0x195   : > { %v470_v40 = vmax.f32 %v466_v38, 0.0  ;;  %v476_v48 = vand.u32 2147483648, %v467_v35  ;;  %vm475_vm3 = vcmp.eq.f32.partialorder %v467_v35, 0.0 }
 0x196   : > { %v469_v41 = vmax.f32 %v465_v39, 0.0 }
 0x197   : > { %1072 = vrsqrt.f32 %v470_v40  ;;  %vm494_vm4 = vcmp.eq.f32.partialorder %v470_v40, inf  ;;  %vm496_vm5 = vcmp.eq.f32.partialorder %v470_v40, 0.0  ;;  %v497_v57 = vand.u32 2147483648, %v470_v40 }
 0x198   : > { %1074 = vrsqrt.f32 %v469_v41  ;;  %vm487_vm6 = vcmp.eq.f32.partialorder %v469_v41, inf  ;;  %v490_v61 = vand.u32 2147483648, %v469_v41  ;;  %vm489_vm7 = vcmp.eq.f32.partialorder %v469_v41, 0.0 }
 0x19d   : > { %v1069_v42 = vpop.eup %1068 }
 0x19e   : > { %v1071_v43 = vpop.eup %1070  ;;  %v479_v44 = vmul.f32 %v1069_v42, %v468_v31 }
 0x19f   : > { %v472_v46 = vmul.f32 %v1071_v43, %v467_v35 }
 0x1a0   : > { %v481_v47 = vsel %vm480_vm0, %v468_v31, %v479_v44 }
 0x1a1   : > { %v474_v49 = vsel %vm473_vm2, %v467_v35, %v472_v46  ;;  %v484_v50 = vsel %vm482_vm1, %v483_v45, %v481_v47  ;;  %v1073_v51 = vpop.eup %1072 }
 0x1a2   : > { %v477_v52 = vsel %vm475_vm3, %v476_v48, %v474_v49  ;;  %v500_v53 = vmul.f32 -0.17677669, %v484_v50  ;;  %v1075_v54 = vpop.eup %1074  ;;  %v493_v55 = vmul.f32 %v1073_v51, %v470_v40 }
 0x1a3   : > { %v499_v56 = vmul.f32 -0.17677669, %v477_v52  ;;  %v486_v58 = vmul.f32 %v1075_v54, %v469_v41 }
 0x1a4   : > { %v505_v59 = vmul.f32 1.442695, %v500_v53  ;;  %v495_v60 = vsel %vm494_vm4, %v470_v40, %v493_v55 }
 0x1a5   : > { %v503_v62 = vmul.f32 1.442695, %v499_v56  ;;  %v488_v63 = vsel %vm487_vm6, %v469_v41, %v486_v58  ;;  %v498_v0 = vsel %vm496_vm5, %v497_v57, %v495_v60 }
 0x1a6   : > { %1076 = vpow2.f32 %v505_v59  ;;  %v491_v1 = vsel %vm489_vm7, %v490_v61, %v488_v63  ;;  %v502_v2 = vmul.f32 -0.17677669, %v498_v0 }
 0x1a7   : > { %1078 = vpow2.f32 %v503_v62  ;;  %v501_v3 = vmul.f32 -0.17677669, %v491_v1 }
 0x1a8   : > { %v509_v4 = vmul.f32 1.442695, %v502_v2 }
 0x1a9   : > { %v507_v5 = vmul.f32 1.442695, %v501_v3 }
 0x1aa   : > { %1080 = vpow2.f32 %v509_v4 }
 0x1ab   : > { %1082 = vpow2.f32 %v507_v5 }
 0x1b0   : > { %v1077_v13 = vpop.eup %1076 }
 0x1b1   : > { %v1079_v15 = vpop.eup %1078  ;;  %v512_v17 = vmul.f32 %v1077_v13, %v861_v10 }
 0x1b2   : > { %v511_v16 = vmul.f32 %v1079_v15, %v860_v9 }
 0x1b4   : > { %929 = vmatprep.mubr.msk.f32.mxu1 %vm519_vm8, %v511_v16  ;;  %v1081_v20 = vpop.eup %1080 }
 0x1b5   : > { %930 = vmatmul.mubr.msk.f32.vlgmr.msra.gmra.mrb[0].mxu1 %vm519_vm8, %v512_v17  ;;  %v1083_v21 = vpop.eup %1082  ;;  %v514_v23 = vmul.f32 %v1081_v20, %v865_v19 }
 0x1b6   : > { %v513_v22 = vmul.f32 %v1083_v21, %v864_v18 }
 0x1b8   : > { %932 = vmatprep.mubr.msk.f32.mxu1 %vm519_vm8, %v513_v22 }
 0x1b9   : > { %933 = vmatmul.mubr.msk.f32.gmra.mrb[2].mxu1 %vm519_vm8, %v514_v23 }
 0x288   : > { %v931_v25 = vpop.f32.mrb[0].mxu1 }
 0x289   : > { %638 = vrot.lane.b32.xlu1 %v931_v25, %s1310_s7  ;;  %v598_v26 = vpop.f32.mrb[1].mxu1 }
 0x28a   : > { %636 = vrot.lane.b32.xlu0 %v598_v26, %s1310_s7 }
 0x28c   : > { %v934_v27 = vpop.f32.mrb[2].mxu1 }
 0x28d   : > { %642 = vrot.lane.b32.xlu1 %v934_v27, %s1310_s7  ;;  %v608_v28 = vpop.f32.mrb[3].mxu1 }
 0x28e   : > { %640 = vrot.lane.b32.xlu0 %v608_v28, %s1310_s7 }
 0x2fb   : > { %v639_v29 = vpop.permute.xlu1 %638 }
 0x2fc   : > { %1084 = vrcp.f32 %v639_v29  ;;  %v637_v30 = vpop.permute.xlu0 %636 }
 0x2fd   : > { %1086 = vrcp.f32 %v637_v30 }
 0x2ff   : > { %v643_v31 = vpop.permute.xlu1 %642 }
 0x300   : > { %1088 = vrcp.f32 %v643_v31  ;;  %v641_v32 = vpop.permute.xlu0 %640 }
 0x301   : > { %1090 = vrcp.f32 %v641_v32 }
 0x306   : > { %v1085_v33 = vpop.eup %1084 }
 0x307   : > { %v1087_v34 = vpop.eup %1086  ;;  %v651_v35 = vmul.f32 %v1085_v33, %v1594_v11 }
 0x308   : > { %v649_v36 = vmul.f32 %v1087_v34, %v1587_v7 }
 0x309   : > { %663 = vperm.xlu1 %1066, %v651_v35  }
 0x30a   : > { %658 = vperm.xlu0 %1067, %v649_v36   ;;  %v1089_v37 = vpop.eup %1088 }
 0x30b   : > { %v1091_v38 = vpop.eup %1090  ;;  %v655_v39 = vmul.f32 %v1089_v37, %v1596_v12 }
 0x30c   : > { %v653_v40 = vmul.f32 %v1091_v38, %v1590_v8 }
 0x30e   : > { %673 = vperm.xlu0 %1067, %v655_v39   ;;  %668 = vperm.xlu1 %1066, %v653_v40  }
 0x388   : > { %v664_v41 = vpop.permute.xlu1 %663 }
 0x389   : > { %v677_v42 = vmul.f32 %v931_v25, %v664_v41  ;;  %v659_v43 = vpop.permute.xlu0 %658 }
 0x38a   : > { %v676_v7 = vmul.f32 %v659_v43, %v598_v26 }
 0x38b   : > { %681 = vst [vmem:[%s310_s13 + $0x8] sm:$0xff] %v677_v42 }
 0x38c   : > { %680 = vst [vmem:[%s310_s13] sm:$0xff] %v676_v7 }
 0x38d   : > { %v674_v11 = vpop.permute.xlu0 %673  ;;  %v669_v8 = vpop.permute.xlu1 %668 }
 0x38e   : > { %v679_v12 = vmul.f32 %v934_v27, %v674_v11  ;;  %v678_v44 = vmul.f32 %v669_v8, %v608_v28 }
 0x390   : > { %683 = vst [vmem:[%s310_s13 + $0x18] sm:$0xff] %v679_v12  ;;  %682 = vst [vmem:[%s310_s13 + $0x10] sm:$0xff] %v678_v44 }
 0x391   : > { %1221 = shalt.err (!%p1218_p10)
}
 0x392   : > { %s1222_s21 = scalar_lea.hbm %s1617_s26, 512  ;;  %s1226_s12 = scalar_lea.hbm %s1670_s4, 1024 }
 0x393   : > { %p1223_p7 = scmp.ne.s32.totalorder %s1617_s26, %s1222_s21  ;;  %p1227_p9 = scmp.lt.u32.totalorder %s1617_s26, %s1670_s4 }
 0x394   : > { %p1228_p3 = scmp.lt.u32.totalorder %s1226_s12, %s1222_s21  ;;  %p1230_p0 = scmp.lt.u32.totalorder %s1222_s21, %s1617_s26 }
 0x395   : > { %p1224_p13 = pnand %p1223_p7, %p1705_p12 }
 0x396   : > { %p1229_p6 = por %p1228_p3, %p1227_p9 }
 0x397   : > { %p1225_p4 = pneg %p1224_p13 }
 0x398   : > { %p1231_p1 = por %p1230_p0, %p1229_p6 }
 0x39a   : > { %p1232_p2 = pnand %p1231_p1, %p1225_p4 }
 0x39c   : > { %1235 = shalt.err (!%p1232_p2)
}
 0x39d   : > { %s1312_s14 = smov 128   ;;  %s1313_s25 = smov 8  }
 0x39e   : > { %979 = dma.vmem_to_hbm [thread:$0]  (%p1705_p12), %s1612_s24, 512, %s1617_s26, %s685_s28, %s1312_s14, %s1312_s14, %s1313_s25  }
 0x39f PF: > { %s713_s7 = sand.u32 1, %s1278_s15   ;;  %p1706_p11 = scmp.ne.s32.totalorder %s1691_s8, 0 }
 0x3a0   : > { %p1707_p5 = scmp.ge.s32.totalorder %s1298_s20, 2  ;;  %s714_s13 = scalar_lea.sflag [#allocation5], %s713_s7 }
 0x3a2   : > { %p996_p8 = pnand %p1707_p5, %p1706_p11 }
 0x3a4   : > { %1273 = dma.done.wait (!%p996_p8), %s714_s13, 512  }
 0x3a5   : > { %1275 = vsyncadd (!%p996_p8), %s714_s13, 4294966784  ;;  %s22_s20 = sadd.s32 1, %s1298_s20   ;;  %s1708_s5 = sld [smem:[#allocation18_spill]] }
 0x3a6   : > { %p19_p10 = scmp.ge.s32.totalorder %s22_s20, 4   ;;  %s1709_s18 = sld [smem:[#allocation16_spill]] }
 0x3a7   : > { %s1710_s19 = sld [smem:[#allocation17_spill]]  ;;  %s1711_s15 = smov %s1282_s16 }
 0x3a8   : > { %s1712_s16 = smov %s1286_s17  ;;  %21 = sbr.rel (!%p19_p10) target bundleno = 10 (0xa), region = 111 }
 0x3ab   : > { %s1713_s17 = smov %s1708_s5 }
 0x3af   :  { %719 = vsyncpa [#allocation4], 1 }
 0x3b0   :  { %721 = vsyncpa [#allocation4 + $0x1], 1 }
 0x3b1   :  { %722 = vsyncpa [#allocation7], 1 }
 0x3b2   :  { %724 = vsyncpa [#allocation7 + $0x1], 1 }
 0x3b3   :  { %725 = vsyncpa [#allocation10], 1 }
 0x3b4   :  { %726 = vsyncpa [#allocation5], 1 }
 0x3b5   :  { %728 = vsyncpa [#allocation5 + $0x1], 1 }

</bundles_post_ra>
